<compile_context>
chip_gen: v7x
topology: tpu7x:2x2x1
jax: 0.10.0
libtpu: 0.0.40
codegen_flags: <defaults>
</compile_context>

<pallas_src>
import functools

import jax
import jax.numpy as jnp
from jax.experimental import pallas as pl
from jax.experimental.pallas import tpu as pltpu


def _rmsnorm_kernel(x_ref, w_ref, o_ref, *, eps: float):
    # All math in float32 (matches torch: x.float(), (1 + weight.float())).
    x = x_ref[...].astype(jnp.float32)                  # (tile_rows, dim)
    wplus1 = 1.0 + w_ref[...].astype(jnp.float32)       # (1, dim), hoisted once
    ms = jnp.mean(x * x, axis=-1, keepdims=True)        # lane reduction (XLU)
    inv = jax.lax.rsqrt(ms + eps)                       # EUP slot (free-ish)
    o_ref[...] = ((x * inv) * wplus1).astype(o_ref.dtype)


def _pick_row_tile(rows: int, dim: int, x_itemsize: int, o_itemsize: int) -> int:
    """Largest power-of-two row tile (>=16, <=1024) whose double-buffered
    in/out blocks plus f32 working set fit a conservative VMEM budget that is
    safe on v5e/v6e (128 MiB) and v7x (64 MiB)."""
    # per-row bytes: 2x-buffered input + 2x-buffered output + ~f32 temps.
    per_row = 2 * dim * x_itemsize + 2 * dim * o_itemsize + 8 * dim
    budget = 16 << 20  # 16 MiB working budget — well under v7x's 64 MiB VMEM/TC
    tile = max(16, min(1024, budget // max(per_row, 1)))
    tile = 1 << (int(tile).bit_length() - 1)            # round down to pow2
    # Don't over-size the tile for small inputs (avoids pointless padding while
    # keeping the tile a multiple of 16 for bf16 sublane packing).
    while tile > 16 and tile // 2 >= rows:
        tile //= 2
    return tile


def gemma_rms_norm(x: jax.Array, weight: jax.Array, eps: float = 1e-6,
                   row_tile: int | None = None) -> jax.Array:
    """RMSNorm over the last axis of x, scaled by (1 + weight)."""
    orig_shape = x.shape
    dim = orig_shape[-1]
    assert weight.shape == (dim,)

    rows = 1
    for s in orig_shape[:-1]:
        rows *= s
    x2d = x.reshape(rows, dim)
    w2d = weight.reshape(1, dim)

    x_isz = jnp.dtype(x.dtype).itemsize
    o_isz = x_isz
    w_isz = jnp.dtype(weight.dtype).itemsize
    if row_tile is None:
        row_tile = _pick_row_tile(rows, dim, x_isz, o_isz)

    # Uniform tile + cdiv grid; Pallas masks the partial last block.
    grid = (pl.cdiv(rows, row_tile),)

    # Scoped VMEM for the chosen tile: double-buffered in/out + weight + f32
    # intermediates, plus headroom.  Capped well under physical VMEM on v7x.
    vmem_bytes = (2 * row_tile * dim * x_isz
                  + 2 * row_tile * dim * o_isz
                  + 2 * dim * w_isz
                  + 8 * row_tile * dim
                  + (2 << 20))
    vmem_bytes = int(min(vmem_bytes, 100 << 20))

    cost = pl.CostEstimate(
        flops=4 * rows * dim,
        transcendentals=rows,
        bytes_accessed=rows * dim * (x_isz + o_isz) + dim * w_isz,
    )

    out2d = pl.pallas_call(
        functools.partial(_rmsnorm_kernel, eps=eps),
        out_shape=jax.ShapeDtypeStruct((rows, dim), x.dtype),
        grid_spec=pltpu.PrefetchScalarGridSpec(
            num_scalar_prefetch=0,
            grid=grid,
            in_specs=[
                pl.BlockSpec((row_tile, dim), lambda i: (i, 0)),   # x row tile
                pl.BlockSpec((1, dim), lambda i: (0, 0)),          # weight (broadcast)
            ],
            out_specs=pl.BlockSpec((row_tile, dim), lambda i: (i, 0)),
        ),
        compiler_params=pltpu.CompilerParams(
            dimension_semantics=("parallel",),
            vmem_limit_bytes=vmem_bytes,
        ),
        cost_estimate=cost,
    )(x2d, w2d)

    return out2d.reshape(orig_shape)


def _reference(x, weight, eps=1e-6):
    xf = x.astype(jnp.float32)
    ms = jnp.mean(xf * xf, axis=-1, keepdims=True)
    normed = xf * jax.lax.rsqrt(ms + eps)
    out = normed * (1.0 + weight.astype(jnp.float32))
    return out.astype(x.dtype)


if __name__ == "__main__":
    key = jax.random.PRNGKey(0)
    kx, kw, kx2 = jax.random.split(key, 3)

    # Primary small-shape check (bf16 activations, f32 weight).
    batch, seq, dim = 2, 8, 32
    x = jax.random.normal(kx, (batch, seq, dim), dtype=jnp.float32).astype(jnp.bfloat16)
    # Module __init__ zero-inits the weight; use a small deterministic random
    # weight here so the (1 + weight) path is exercised.
    weight = 0.1 * jax.random.normal(kw, (dim,), dtype=jnp.float32)

    out = gemma_rms_norm(x, weight, eps=1e-6)
    out = jax.block_until_ready(out)

    ref = _reference(x, weight, eps=1e-6)
    assert out.shape == x.shape and out.dtype == x.dtype
    err = jnp.max(jnp.abs(out.astype(jnp.float32) - ref.astype(jnp.float32)))
    assert float(err) < 1e-2, f"max abs err {err}"

    # Secondary check: ragged row count (rows not a multiple of the tile)
    # exercises the cdiv grid + masked partial last block path.
    x2 = jax.random.normal(kx2, (3, 5, dim), dtype=jnp.float32)
    out2 = jax.block_until_ready(gemma_rms_norm(x2, weight, eps=1e-6))
    ref2 = _reference(x2, weight, eps=1e-6)
    err2 = jnp.max(jnp.abs(out2 - ref2))
    assert float(err2) < 1e-4, f"max abs err (ragged) {err2}"

    print("KERNEL_OK")
</pallas_src>

<mosaic_0001>
module attributes {stable_mosaic.version = 11 : i64} {
  func.func @_rmsnorm_kernel(%arg0: i32, %arg1: memref<16x32xbf16, #tpu.memory_space<vmem>>, %arg2: memref<1x32xf32, #tpu.memory_space<vmem>>, %arg3: memref<16x32xbf16, #tpu.memory_space<vmem>>) attributes {dimension_semantics = [#tpu.dimension_semantics<parallel>], iteration_bounds = array<i64: 1>, scalar_prefetch = 0 : i64, scratch_operands = 0 : i64, tpu.core_type = #tpu.core_type<tc>, window_params = [{transform_indices = @transform_0, window_bounds = array<i64: 16, 32>}, {pipeline_mode = #tpu.pipeline_mode<synchronous>, transform_indices = @transform_1, window_bounds = array<i64: 1, 32>}, {transform_indices = @transform_2, window_bounds = array<i64: 16, 32>}]} {
    %c0 = arith.constant 0 : index
    %c0_0 = arith.constant 0 : index
    %0 = vector.load %arg1[%c0, %c0_0] : memref<16x32xbf16, #tpu.memory_space<vmem>>, vector<16x32xbf16>
    %1 = arith.extf %0 : vector<16x32xbf16> to vector<16x32xf32>
    %c0_1 = arith.constant 0 : index
    %c0_2 = arith.constant 0 : index
    %2 = vector.load %arg2[%c0_1, %c0_2] : memref<1x32xf32, #tpu.memory_space<vmem>>, vector<1x32xf32>
    %cst = arith.constant 1.000000e+00 : f32
    %3 = vector.broadcast %cst : f32 to vector<1x32xf32>
    %4 = arith.addf %3, %2 : vector<1x32xf32>
    %5 = arith.mulf %1, %1 : vector<16x32xf32>
    %cst_3 = arith.constant dense<0.000000e+00> : vector<16xf32>
    %6 = vector.multi_reduction <add>, %5, %cst_3 [1] : vector<16x32xf32> to vector<16xf32>
    %7 = vector.shape_cast %6 : vector<16xf32> to vector<16x1xf32>
    %cst_4 = arith.constant 3.200000e+01 : f32
    %8 = vector.broadcast %cst_4 : f32 to vector<16x1xf32>
    %9 = arith.divf %7, %8 : vector<16x1xf32>
    %cst_5 = arith.constant 9.99999997E-7 : f32
    %10 = vector.broadcast %cst_5 : f32 to vector<16x1xf32>
    %11 = arith.addf %9, %10 : vector<16x1xf32>
    %12 = math.rsqrt %11 : vector<16x1xf32>
    %13 = vector.broadcast %12 : vector<16x1xf32> to vector<16x32xf32>
    %14 = arith.mulf %1, %13 : vector<16x32xf32>
    %15 = vector.broadcast %4 : vector<1x32xf32> to vector<16x32xf32>
    %16 = arith.mulf %14, %15 : vector<16x32xf32>
    %17 = arith.truncf %16 : vector<16x32xf32> to vector<16x32xbf16>
    %c0_6 = arith.constant 0 : index
    %c0_7 = arith.constant 0 : index
    %18 = vector.load %arg3[%c0_6, %c0_7] : memref<16x32xbf16, #tpu.memory_space<vmem>>, vector<16x32xbf16>
    tpu.vector_store %arg3[%c0_6, %c0_7], %17 {strides = array<i32>} : memref<16x32xbf16, #tpu.memory_space<vmem>>, vector<16x32xbf16>,
    return
  }
  func.func @transform_0(%arg0: i32) -> (i32, i32) {
    %c0_i32 = arith.constant 0 : i32
    %c0_i32_0 = arith.constant 0 : i32
    return %arg0, %c0_i32 : i32, i32
  }
  func.func @transform_1(%arg0: i32) -> (i32, i32) {
    %c0_i32 = arith.constant 0 : i32
    %c0_i32_0 = arith.constant 0 : i32
    %c0_i32_1 = arith.constant 0 : i32
    return %c0_i32, %c0_i32_0 : i32, i32
  }
  func.func @transform_2(%arg0: i32) -> (i32, i32) {
    %c0_i32 = arith.constant 0 : i32
    %c0_i32_0 = arith.constant 0 : i32
    return %arg0, %c0_i32 : i32, i32
  }
}

</mosaic_0001>

<bundles_post_ra>
// kernel: tpu_custom_call.1
= control target key start
LH: loop header
LB: loop body
LE: loop exit
PB: predicated region body
PF: predicated region fallthrough
CT: control target
= control target key end

     0   :  { %7 = vsyncpa [#allocation3], 0  ;;  %s202_s0 = inlined_call_operand.hbm [shape: bf16[16,32], index: 0, kind: input, shape index: {}]   ;;  %s203_s1 = inlined_call_operand.vmem [shape: f32[1,32], index: 1, kind: input, shape index: {}]   ;;  %s204_s2 = inlined_call_operand.hbm [shape: bf16[16,32], index: 2, kind: output, shape index: {}]  }
   0x1   :  { %8 = vsyncpa [#allocation4], 0  ;;  %s150_s9 = smov [#allocation2]   ;;  %s102_s13 = scalar_lea.hbm %s202_s0, 128 }
   0x2   :  { %s14_s10 = sshll.u32 %s150_s9, 4  ;;  %p103_p0 = scmp.ne.s32.totalorder %s202_s0, %s102_s13  ;;  %s15_s10 = int_to_ptr.vmem [resolvable:$true] %s14_s10 }
   0x3   :  { %p106_p1 = scmp.lt.u32.totalorder %s102_s13, %s202_s0 }
   0x5   :  { %p108_p2 = pnand %p106_p1, %p103_p0 }
   0x7   :  { %111 = shalt.err (!%p108_p2)
}
   0x8   :  { %s112_s18 = scalar_lea.vmem %s15_s10, 128  ;;  %p117_p4 = scmp.lt.s32.totalorder %s15_s10, %s15_s10 }
   0x9   :  { %p113_p3 = scmp.ne.s32.totalorder %s15_s10, %s112_s18  ;;  %p118_p5 = scmp.lt.s32.totalorder %s112_s18, %s112_s18 }
   0xb   :  { %p119_p6 = por %p118_p5, %p117_p4 }
   0xd   :  { %p120_p7 = pnand %p119_p6, %p113_p3 }
   0xf   :  { %123 = shalt.err (!%p120_p7)
}
  0x10   :  { %s151_s19 = smov 64   ;;  %s152_s20 = smov 4  }
  0x11   :  { %20 = dma.hbm_to_vmem [thread:$0]  %s202_s0, 128, %s15_s10, [#allocation3], %s151_s19, %s151_s19, %s152_s20  }
  0x12   :  { %146 = dma.done.wait [#allocation3], 128  }
  0x13   :  { %147 = vsyncadd [#allocation3], 4294967168  ;;  %v91_v0 = vld [vmem:[#allocation2] sm:$0xff]   ;;  %vm34_vm0 = vcmask 261120   ;;  %v51_v9 = vlaneseq  ;;  %vm66_vm1 = vcmask 257024   ;;  %s153_s24 = smov [#allocation5]  }
  0x14   :  { %v92_v1 = vunpack.c.l.bf16 %v91_v0  ;;  %v93_v2 = vunpack.c.h.bf16 %v91_v0  ;;  %v30_v15 = vld [vmem:[%s203_s1] sm:$0x1]  ;;  %s74_s25 = sshll.u32 %s153_s24, 4  ;;  %s75_s25 = int_to_ptr.vmem [resolvable:$true] %s74_s25 }
  0x15   :  { %v52_v13 = vshrl.u32 %v51_v9, 7  ;;  %v31_v16 = vadd.f32 1.0, %v30_v15  ;;  %s124_s26 = scalar_lea.vmem %s75_s25, 128  ;;  %p129_p9 = scmp.lt.s32.totalorder %s75_s25, %s75_s25 }
  0x16   :  { %v32_v3 = vmul.f32 %v92_v1, %v92_v1  ;;  %v33_v4 = vmul.f32 %v93_v2, %v93_v2  ;;  %p125_p8 = scmp.ne.s32.totalorder %s75_s25, %s124_s26  ;;  %p130_p10 = scmp.lt.s32.totalorder %s124_s26, %s124_s26 }
  0x17   :  { %v53_v17 = vsub.s32 0, %v52_v13 }
  0x18   :  { %v35_v5 = vsel %vm34_vm0, %v32_v3, 0.0  ;;  %v38_v6 = vsel %vm34_vm0, %v33_v4, 0.0  ;;  %p131_p11 = por %p130_p10, %p129_p9 }
  0x19   :  { %36 = vadd.xlane.f32.xlu0 %v35_v5  ;;  %v54_v18 = vrot.slane %v31_v16, %v53_v17 }
  0x1a   :  { %p132_p12 = pnand %p131_p11, %p125_p8 }
  0x1d   :  { %39 = vadd.xlane.f32.xlu0 %v38_v6 }
  0xa6   :  { %v37_v7 = vpop.xlane.xlu0 %36 }
  0xa7   :  { %v42_v8 = vmul.f32 0.03125, %v37_v7 }
  0xa9   :  { %v44_v10 = vadd.f32 1e-06, %v42_v8 }
  0xaa   :  { %v40_v11 = vpop.xlane.xlu0 %39 }
  0xab   :  { %98 = vrsqrt.f32 %v44_v10  ;;  %v43_v12 = vmul.f32 0.03125, %v40_v11 }
  0xad   :  { %v45_v14 = vadd.f32 1e-06, %v43_v12 }
  0xaf   :  { %100 = vrsqrt.f32 %v45_v14 }
  0xb5   :  { %v99_v19 = vpop.eup %98 }
  0xb6   :  { %v48_v20 = vmul.f32 %v99_v19, %v92_v1 }
  0xb8   :  { %v56_v21 = vmul.f32 %v54_v18, %v48_v20 }
  0xb9   :  { %v101_v22 = vpop.eup %100 }
  0xba   :  { %v49_v23 = vmul.f32 %v101_v22, %v93_v2  ;;  %v88_v24 = vpack.c.bf16 %v56_v21, %v56_v21 }
  0xbc   :  { %v57_v25 = vmul.f32 %v54_v18, %v49_v23  ;;  %67 = vst.msk [vmem:[#allocation5] sm:$0xf] %vm66_vm1, %v88_v24 }
  0xbe   :  { %v89_v26 = vpack.c.bf16 %v57_v25, %v57_v25 }
  0xc0   :  { %68 = vst.msk [vmem:[#allocation5 + $0x4] sm:$0xf] %vm66_vm1, %v89_v26 }
  0xc1   :  { %135 = shalt.err (!%p132_p12)
}
  0xc2   :  { %s136_s28 = scalar_lea.hbm %s204_s2, 128 }
  0xc3   :  { %p137_p13 = scmp.ne.s32.totalorder %s204_s2, %s136_s28  ;;  %p140_p0 = scmp.lt.u32.totalorder %s136_s28, %s204_s2 }
  0xc5   :  { %p142_p1 = pnand %p140_p0, %p137_p13 }
  0xc7   :  { %145 = shalt.err (!%p142_p1)
}
  0xc8   :  { %80 = dma.vmem_to_hbm [thread:$0]  %s75_s25, 128, %s204_s2, [#allocation4], %s151_s19, %s151_s19, %s152_s20  }
  0xc9   :  { %148 = dma.done.wait [#allocation4], 128  }
  0xca   :  { %149 = vsyncadd [#allocation4], 4294967168 }
  0xcb   :  { %84 = vsyncpa [#allocation3], 1 }
  0xcc   :  { %85 = vsyncpa [#allocation4], 1 }

</bundles_post_ra>
